<compile_context>
chip_gen: v7x
topology: tpu7x:2x2x1
jax: 0.10.0
libtpu: 0.0.40
codegen_flags: <defaults>
</compile_context>

<pallas_src>
from functools import partial

import jax
import jax.numpy as jnp
from jax.experimental import pallas as pl
from jax.experimental.pallas import tpu as pltpu


def _classifier_kernel(x_ref, w1t_ref, b1_ref, w2t_ref, b2_ref,
                       preds_ref, feats_ref, acc_ref, *, s_total):
    # x_ref:   (1, Cin, TS)  one batch, one spatial tile (S lane-dense)
    # w1t_ref: (Cf, Cin)     b1_ref: (Cf, 1)   -- backbone 1x1 conv (transposed)
    # w2t_ref: (NC, Cf)      b2_ref: (NC, 1)   -- head Linear (transposed)
    # preds_ref: (1, NC, 1)  feats_ref: (1, Cf, 1)
    # acc_ref:  (Cf, TS) f32 running pooled-sum accumulator
    s = pl.program_id(1)
    cin, ts = x_ref.shape[1], x_ref.shape[2]
    cf = w1t_ref.shape[0]

    @pl.when(s == 0)
    def _():
        acc_ref[...] = jnp.zeros_like(acc_ref)

    x = x_ref[0].astype(jnp.float32)                      # (Cin, TS), f32 math

    if cin <= 8:
        # Tiny contraction depth: Cin-step VPU broadcast-FMA (keeps S lane-dense,
        # avoids a ~3%-depth MXU matmul and the x relayout it would need).
        conv = w1t_ref[:, 0:1] * x[0:1, :]                # (Cf, TS)
        for c in range(1, cin):
            conv = conv + w1t_ref[:, c:c + 1] * x[c:c + 1, :]
    else:
        conv = jnp.dot(w1t_ref[...], x, preferred_element_type=jnp.float32)

    h = jnp.maximum(conv + b1_ref[...], 0.0)              # bias + ReLU (f32)

    if s_total % ts != 0:
        # Mask the ragged spatial tail so padding never enters the pooled sum.
        lane = jax.lax.broadcasted_iota(jnp.int32, (cf, ts), 1)
        h = jnp.where(s * ts + lane < s_total, h, 0.0)

    acc_ref[...] += h                                     # running pooled sum

    @pl.when(s == pl.num_programs(1) - 1)
    def _():
        # AdaptiveAvgPool2d((1,1)) + Flatten: one lane-reduce per batch.
        feat = jnp.sum(acc_ref[...], axis=1, keepdims=True) * (1.0 / s_total)
        # Head Linear: (NC, Cf) @ (Cf, 1)
        pred = jnp.dot(w2t_ref[...], feat,
                       preferred_element_type=jnp.float32) + b2_ref[...]
        feats_ref[0] = feat.astype(feats_ref.dtype)
        preds_ref[0] = pred.astype(preds_ref.dtype)


def classifier_forward(x_nchw, w1, b1, w2, b2, *, spatial_tile=2048):
    """Returns (predictions (N, num_classes), features (N, Cf)), both float32."""
    N, Cin, H, W = x_nchw.shape
    Cf = w1.shape[1]
    NC = w2.shape[1]
    S = H * W

    # Spatial tile: multiple of 128 lanes when possible, capped for VMEM.
    if S >= 128:
        TS = max(128, min(int(spatial_tile), (S // 128) * 128))
    else:
        TS = S
    num_s = pl.cdiv(S, TS)

    # NCHW -> (N, Cin, S) is a contiguous reshape: NO extra HBM transpose pass.
    x = x_nchw.reshape(N, Cin, S)

    # Weights are tiny: keep them f32 and pre-transpose so the kernel needs no
    # in-kernel transposes at all.
    w1t = jnp.asarray(w1, jnp.float32).T                  # (Cf, Cin)
    b1c = jnp.asarray(b1, jnp.float32).reshape(Cf, 1)
    w2t = jnp.asarray(w2, jnp.float32).T                  # (NC, Cf)
    b2c = jnp.asarray(b2, jnp.float32).reshape(NC, 1)

    flops = 2 * N * S * Cin * Cf + 2 * N * Cf * NC
    bytes_accessed = (x.size * x.dtype.itemsize
                      + (w1t.size + b1c.size + w2t.size + b2c.size) * 4
                      + N * (Cf + NC) * 4)

    grid_spec = pltpu.PrefetchScalarGridSpec(
        num_scalar_prefetch=0,
        grid=(N, num_s),                                  # reduction axis last
        in_specs=[
            pl.BlockSpec((1, Cin, TS), lambda n, s: (n, 0, s)),
            pl.BlockSpec((Cf, Cin), lambda n, s: (0, 0)),
            pl.BlockSpec((Cf, 1), lambda n, s: (0, 0)),
            pl.BlockSpec((NC, Cf), lambda n, s: (0, 0)),
            pl.BlockSpec((NC, 1), lambda n, s: (0, 0)),
        ],
        out_specs=(
            pl.BlockSpec((1, NC, 1), lambda n, s: (n, 0, 0)),
            pl.BlockSpec((1, Cf, 1), lambda n, s: (n, 0, 0)),
        ),
        scratch_shapes=[pltpu.VMEM((Cf, TS), jnp.float32)],
    )

    preds_c, feats_c = pl.pallas_call(
        partial(_classifier_kernel, s_total=S),
        out_shape=(jax.ShapeDtypeStruct((N, NC, 1), jnp.float32),
                   jax.ShapeDtypeStruct((N, Cf, 1), jnp.float32)),
        grid_spec=grid_spec,
        compiler_params=pltpu.CompilerParams(
            dimension_semantics=("parallel", "arbitrary"),
            vmem_limit_bytes=32 * 1024 * 1024),
        cost_estimate=pl.CostEstimate(flops=flops, transcendentals=0,
                                      bytes_accessed=bytes_accessed),
    )(x, w1t, b1c, w2t, b2c)

    return preds_c.reshape(N, NC), feats_c.reshape(N, Cf)


def reference_forward(x_nchw, w1, b1, w2, b2):
    # Pure-JAX reference mirroring the PyTorch semantics (f32).
    xt = jnp.transpose(x_nchw.astype(jnp.float32), (0, 2, 3, 1))   # (N,H,W,Cin)
    h = jnp.maximum(jnp.einsum('nhwc,cf->nhwf', xt, w1) + b1, 0.0)
    feat = jnp.mean(h, axis=(1, 2))                                # (N, Cf)
    pred = feat @ w2 + b2                                          # (N, NC)
    return pred, feat


if __name__ == "__main__":
    # Small shapes: batch=2, in-channels=4, spatial=16x16,
    # backbone out_features (= features_dim) = 32, num_classes = 8.
    N, Cin, H, W = 2, 4, 16, 16
    Cf, NC = 32, 8

    key = jax.random.PRNGKey(0)
    kx, kw1, kb1, kw2, kb2 = jax.random.split(key, 5)

    x = jax.random.normal(kx, (N, Cin, H, W), dtype=jnp.float32)
    w1 = jax.random.normal(kw1, (Cin, Cf), dtype=jnp.float32) * 0.1
    b1 = jax.random.normal(kb1, (Cf,), dtype=jnp.float32) * 0.1
    w2 = jax.random.normal(kw2, (Cf, NC), dtype=jnp.float32) * 0.1
    b2 = jax.random.normal(kb2, (NC,), dtype=jnp.float32) * 0.1

    ref_preds, ref_feats = reference_forward(x, w1, b1, w2, b2)

    # f32 input path (matches PyTorch semantics bit-for-bit up to fp rounding).
    preds, feats = classifier_forward(x, w1, b1, w2, b2)
    jax.block_until_ready((preds, feats))
    assert preds.shape == (N, NC) and feats.shape == (N, Cf)
    assert bool(jnp.allclose(preds, ref_preds, rtol=1e-5, atol=1e-5))
    assert bool(jnp.allclose(feats, ref_feats, rtol=1e-5, atol=1e-5))

    # bf16 input path (perf path: halves HBM bytes on the mem-bound x stream;
    # accumulation stays f32 in-kernel), checked at bf16 tolerance.
    preds_bf, feats_bf = classifier_forward(x.astype(jnp.bfloat16), w1, b1, w2, b2)
    jax.block_until_ready((preds_bf, feats_bf))
    assert bool(jnp.allclose(preds_bf, ref_preds, rtol=5e-2, atol=5e-2))
    assert bool(jnp.allclose(feats_bf, ref_feats, rtol=5e-2, atol=5e-2))

    print("KERNEL_OK")
</pallas_src>

<mosaic_0001>
module attributes {stable_mosaic.version = 11 : i64} {
  func.func @_classifier_kernel(%arg0: i32, %arg1: i32, %arg2: memref<1x4x256xf32, #tpu.memory_space<vmem>>, %arg3: memref<32x4xf32, #tpu.memory_space<vmem>>, %arg4: memref<32x1xf32, #tpu.memory_space<vmem>>, %arg5: memref<8x32xf32, #tpu.memory_space<vmem>>, %arg6: memref<8x1xf32, #tpu.memory_space<vmem>>, %arg7: memref<1x8x1xf32, #tpu.memory_space<vmem>>, %arg8: memref<1x32x1xf32, #tpu.memory_space<vmem>>, %arg9: memref<32x256xf32, #tpu.memory_space<vmem>>) attributes {dimension_semantics = [#tpu.dimension_semantics<parallel>, #tpu.dimension_semantics<arbitrary>], iteration_bounds = array<i64: 2, 1>, scalar_prefetch = 0 : i64, scratch_operands = 1 : i64, tpu.core_type = #tpu.core_type<tc>, window_params = [{transform_indices = @transform_0, window_bounds = array<i64: 1, 4, 256>}, {pipeline_mode = #tpu.pipeline_mode<synchronous>, transform_indices = @transform_1, window_bounds = array<i64: 32, 4>}, {pipeline_mode = #tpu.pipeline_mode<synchronous>, transform_indices = @transform_2, window_bounds = array<i64: 32, 1>}, {pipeline_mode = #tpu.pipeline_mode<synchronous>, transform_indices = @transform_3, window_bounds = array<i64: 8, 32>}, {pipeline_mode = #tpu.pipeline_mode<synchronous>, transform_indices = @transform_4, window_bounds = array<i64: 8, 1>}, {transform_indices = @transform_5, window_bounds = array<i64: 1, 8, 1>}, {transform_indices = @transform_6, window_bounds = array<i64: 1, 32, 1>}]} {
    %c0_i32 = arith.constant 0 : i32
    %0 = arith.cmpi eq, %arg1, %c0_i32 : i32
    %1 = arith.extui %0 : i1 to i32
    %c0_i32_0 = arith.constant 0 : i32
    %2 = arith.cmpi ne, %1, %c0_i32_0 : i32
    scf.if %2 {
      %cst_16 = arith.constant 0.000000e+00 : f32
      %39 = vector.broadcast %cst_16 : f32 to vector<32x256xf32>
      %c0_17 = arith.constant 0 : index
      %c0_18 = arith.constant 0 : index
      %40 = vector.load %arg9[%c0_17, %c0_18] : memref<32x256xf32, #tpu.memory_space<vmem>>, vector<32x256xf32>
      tpu.vector_store %arg9[%c0_17, %c0_18], %39 {strides = array<i32>} : memref<32x256xf32, #tpu.memory_space<vmem>>, vector<32x256xf32>,
    } else {
    }
    %c0 = arith.constant 0 : index
    %c0_1 = arith.constant 0 : index
    %c0_2 = arith.constant 0 : index
    %3 = vector.load %arg2[%c0, %c0_1, %c0_2] : memref<1x4x256xf32, #tpu.memory_space<vmem>>, vector<1x4x256xf32>
    %4 = vector.shape_cast %3 : vector<1x4x256xf32> to vector<4x256xf32>
    %c0_3 = arith.constant 0 : index
    %c0_4 = arith.constant 0 : index
    %5 = vector.load %arg3[%c0_3, %c0_4] : memref<32x4xf32, #tpu.memory_space<vmem>>, vector<32x1xf32>
    %6 = vector.extract_strided_slice %4 {offsets = [0, 0], sizes = [1, 256], strides = [1, 1]} : vector<4x256xf32> to vector<1x256xf32>
    %7 = vector.broadcast %5 : vector<32x1xf32> to vector<32x256xf32>
    %8 = vector.broadcast %6 : vector<1x256xf32> to vector<32x256xf32>
    %9 = arith.mulf %7, %8 : vector<32x256xf32>
    %c0_5 = arith.constant 0 : index
    %c1 = arith.constant 1 : index
    %10 = vector.load %arg3[%c0_5, %c1] : memref<32x4xf32, #tpu.memory_space<vmem>>, vector<32x1xf32>
    %11 = vector.extract_strided_slice %4 {offsets = [1, 0], sizes = [1, 256], strides = [1, 1]} : vector<4x256xf32> to vector<1x256xf32>
    %12 = vector.broadcast %10 : vector<32x1xf32> to vector<32x256xf32>
    %13 = vector.broadcast %11 : vector<1x256xf32> to vector<32x256xf32>
    %14 = arith.mulf %12, %13 : vector<32x256xf32>
    %15 = arith.addf %9, %14 : vector<32x256xf32>
    %c0_6 = arith.constant 0 : index
    %c2 = arith.constant 2 : index
    %16 = vector.load %arg3[%c0_6, %c2] : memref<32x4xf32, #tpu.memory_space<vmem>>, vector<32x1xf32>
    %17 = vector.extract_strided_slice %4 {offsets = [2, 0], sizes = [1, 256], strides = [1, 1]} : vector<4x256xf32> to vector<1x256xf32>
    %18 = vector.broadcast %16 : vector<32x1xf32> to vector<32x256xf32>
    %19 = vector.broadcast %17 : vector<1x256xf32> to vector<32x256xf32>
    %20 = arith.mulf %18, %19 : vector<32x256xf32>
    %21 = arith.addf %15, %20 : vector<32x256xf32>
    %c0_7 = arith.constant 0 : index
    %c3 = arith.constant 3 : index
    %22 = vector.load %arg3[%c0_7, %c3] : memref<32x4xf32, #tpu.memory_space<vmem>>, vector<32x1xf32>
    %23 = vector.extract_strided_slice %4 {offsets = [3, 0], sizes = [1, 256], strides = [1, 1]} : vector<4x256xf32> to vector<1x256xf32>
    %24 = vector.broadcast %22 : vector<32x1xf32> to vector<32x256xf32>
    %25 = vector.broadcast %23 : vector<1x256xf32> to vector<32x256xf32>
    %26 = arith.mulf %24, %25 : vector<32x256xf32>
    %27 = arith.addf %21, %26 : vector<32x256xf32>
    %c0_8 = arith.constant 0 : index
    %c0_9 = arith.constant 0 : index
    %28 = vector.load %arg4[%c0_8, %c0_9] : memref<32x1xf32, #tpu.memory_space<vmem>>, vector<32x1xf32>
    %29 = vector.broadcast %28 : vector<32x1xf32> to vector<32x256xf32>
    %30 = arith.addf %27, %29 : vector<32x256xf32>
    %cst = arith.constant 0.000000e+00 : f32
    %31 = vector.broadcast %cst : f32 to vector<32x256xf32>
    %32 = arith.maximumf %30, %31 : vector<32x256xf32>
    %c0_10 = arith.constant 0 : index
    %c0_11 = arith.constant 0 : index
    %33 = vector.load %arg9[%c0_10, %c0_11] : memref<32x256xf32, #tpu.memory_space<vmem>>, vector<32x256xf32>
    %34 = arith.addf %33, %32 : vector<32x256xf32>
    %c0_12 = arith.constant 0 : index
    %c0_13 = arith.constant 0 : index
    %35 = vector.load %arg9[%c0_12, %c0_13] : memref<32x256xf32, #tpu.memory_space<vmem>>, vector<32x256xf32>
    tpu.vector_store %arg9[%c0_12, %c0_13], %34 {strides = array<i32>} : memref<32x256xf32, #tpu.memory_space<vmem>>, vector<32x256xf32>,
    %c0_i32_14 = arith.constant 0 : i32
    %36 = arith.cmpi eq, %arg1, %c0_i32_14 : i32
    %37 = arith.extui %36 : i1 to i32
    %c0_i32_15 = arith.constant 0 : i32
    %38 = arith.cmpi ne, %37, %c0_i32_15 : i32
    scf.if %38 {
      %c0_16 = arith.constant 0 : index
      %c0_17 = arith.constant 0 : index
      %39 = vector.load %arg9[%c0_16, %c0_17] : memref<32x256xf32, #tpu.memory_space<vmem>>, vector<32x256xf32>
      %cst_18 = arith.constant dense<0.000000e+00> : vector<32xf32>
      %40 = vector.multi_reduction <add>, %39, %cst_18 [1] : vector<32x256xf32> to vector<32xf32>
      %41 = vector.shape_cast %40 : vector<32xf32> to vector<32x1xf32>
      %cst_19 = arith.constant 3.906250e-03 : f32
      %42 = vector.broadcast %cst_19 : f32 to vector<32x1xf32>
      %43 = arith.mulf %41, %42 : vector<32x1xf32>
      %c0_20 = arith.constant 0 : index
      %c0_21 = arith.constant 0 : index
      %44 = vector.load %arg5[%c0_20, %c0_21] : memref<8x32xf32, #tpu.memory_space<vmem>>, vector<8x32xf32>
      %cst_22 = arith.constant dense<0.000000e+00> : vector<8x1xf32>
      %45 = tpu.matmul %44, %43, %cst_22 {dimension_numbers = #tpu.dot_dimension_numbers<[1], [0], [0], [1], [0, 0, 1, 1], [], []>} : vector<8x32xf32>, vector<32x1xf32>, vector<8x1xf32> -> vector<8x1xf32>
      %c0_23 = arith.constant 0 : index
      %c0_24 = arith.constant 0 : index
      %46 = vector.load %arg6[%c0_23, %c0_24] : memref<8x1xf32, #tpu.memory_space<vmem>>, vector<8x1xf32>
      %47 = arith.addf %45, %46 : vector<8x1xf32>
      %c0_25 = arith.constant 0 : index
      %c0_26 = arith.constant 0 : index
      %c0_27 = arith.constant 0 : index
      %48 = vector.load %arg8[%c0_25, %c0_26, %c0_27] : memref<1x32x1xf32, #tpu.memory_space<vmem>>, vector<1x32x1xf32>
      %49 = vector.shape_cast %48 : vector<1x32x1xf32> to vector<32x1xf32>
      %50 = vector.shape_cast %43 : vector<32x1xf32> to vector<1x32x1xf32>
      tpu.vector_store %arg8[%c0_25, %c0_26, %c0_27], %50 {strides = array<i32>} : memref<1x32x1xf32, #tpu.memory_space<vmem>>, vector<1x32x1xf32>,
      %c0_28 = arith.constant 0 : index
      %c0_29 = arith.constant 0 : index
      %c0_30 = arith.constant 0 : index
      %51 = vector.load %arg7[%c0_28, %c0_29, %c0_30] : memref<1x8x1xf32, #tpu.memory_space<vmem>>, vector<1x8x1xf32>
      %52 = vector.shape_cast %51 : vector<1x8x1xf32> to vector<8x1xf32>
      %53 = vector.shape_cast %47 : vector<8x1xf32> to vector<1x8x1xf32>
      tpu.vector_store %arg7[%c0_28, %c0_29, %c0_30], %53 {strides = array<i32>} : memref<1x8x1xf32, #tpu.memory_space<vmem>>, vector<1x8x1xf32>,
    } else {
    }
    return
  }
  func.func @transform_0(%arg0: i32, %arg1: i32) -> (i32, i32, i32) {
    %c0_i32 = arith.constant 0 : i32
    %c0_i32_0 = arith.constant 0 : i32
    return %arg0, %c0_i32, %arg1 : i32, i32, i32
  }
  func.func @transform_1(%arg0: i32, %arg1: i32) -> (i32, i32) {
    %c0_i32 = arith.constant 0 : i32
    %c0_i32_0 = arith.constant 0 : i32
    %c0_i32_1 = arith.constant 0 : i32
    return %c0_i32, %c0_i32_0 : i32, i32
  }
  func.func @transform_2(%arg0: i32, %arg1: i32) -> (i32, i32) {
    %c0_i32 = arith.constant 0 : i32
    %c0_i32_0 = arith.constant 0 : i32
    %c0_i32_1 = arith.constant 0 : i32
    return %c0_i32, %c0_i32_0 : i32, i32
  }
  func.func @transform_3(%arg0: i32, %arg1: i32) -> (i32, i32) {
    %c0_i32 = arith.constant 0 : i32
    %c0_i32_0 = arith.constant 0 : i32
    %c0_i32_1 = arith.constant 0 : i32
    return %c0_i32, %c0_i32_0 : i32, i32
  }
  func.func @transform_4(%arg0: i32, %arg1: i32) -> (i32, i32) {
    %c0_i32 = arith.constant 0 : i32
    %c0_i32_0 = arith.constant 0 : i32
    %c0_i32_1 = arith.constant 0 : i32
    return %c0_i32, %c0_i32_0 : i32, i32
  }
  func.func @transform_5(%arg0: i32, %arg1: i32) -> (i32, i32, i32) {
    %c0_i32 = arith.constant 0 : i32
    %c0_i32_0 = arith.constant 0 : i32
    %c0_i32_1 = arith.constant 0 : i32
    return %arg0, %c0_i32, %c0_i32_0 : i32, i32, i32
  }
  func.func @transform_6(%arg0: i32, %arg1: i32) -> (i32, i32, i32) {
    %c0_i32 = arith.constant 0 : i32
    %c0_i32_0 = arith.constant 0 : i32
    %c0_i32_1 = arith.constant 0 : i32
    return %arg0, %c0_i32, %c0_i32_0 : i32, i32, i32
  }
}

</mosaic_0001>

<bundles_post_ra>
// kernel: tpu_custom_call.1
= control target key start
LH: loop header
LB: loop body
LE: loop exit
PB: predicated region body
PF: predicated region fallthrough
CT: control target
= control target key end

     0   :  { %s923_s21 = smov 0   ;;  %s925_s22 = smov 0   ;;  %s1006_s0 = inlined_call_operand.vmem [shape: f32[2,4,256], index: 0, kind: input, shape index: {}]   ;;  %s1007_s1 = inlined_call_operand.vmem [shape: f32[32,4], index: 1, kind: input, shape index: {}]   ;;  %s1008_s2 = inlined_call_operand.vmem [shape: f32[32,1], index: 2, kind: input, shape index: {}]   ;;  %s1009_s3 = inlined_call_operand.vmem [shape: f32[8,32], index: 3, kind: input, shape index: {}]   ;;  %s1010_s4 = inlined_call_operand.vmem [shape: f32[8,1], index: 4, kind: input, shape index: {}]   ;;  %s1011_s5 = inlined_call_operand.vmem [shape: f32[2,8,1], index: 5, kind: output, shape index: {0}]   ;;  %s1012_s6 = inlined_call_operand.vmem [shape: f32[2,32,1], index: 6, kind: output, shape index: {1}]  }
   0x1   :  { %s927_s23 = smov 0  }
   0x2 LB: > { %s29_s24 = sadd.s32 1, %s875_s22  ;;  %p782_p0 = scmp.ge.s32.totalorder %s879_s23, 1  ;;  %s879_s23 = sphi %s927_s23, %s17_s23   ;;  %s875_s22 = sphi %s925_s22, %s1014_s22   ;;  %s871_s21 = sphi %s923_s21, %s1013_s21  }
   0x3   : > { %p31_p1 = scmp.ge.s32.totalorder %s29_s24, 2  ;;  %p234_p2 = scmp.lt.s32.totalorder %s879_s23, 3 }
   0x5   : > { %s1016_s24 = smov (%p31_p1, %s29_s24), 0  ;;  %p235_p3 = pnand %p782_p0, %p234_p2 }
   0x6   : > { %v304_v0 = vld [vmem:[%s1007_s1] sm:$0xff] (!%p235_p3)  ;;  %v881_v1 = vmov (!%p235_p3), 3   ;;  %v882_v2 = vmov (!%p235_p3), 1   ;;  %v305_v3 = vld [vmem:[%s1007_s1 + $0x8] sm:$0xff] (!%p235_p3)  ;;  %v883_v4 = vmov (!%p235_p3), 2   ;;  %v307_v5 = vld [vmem:[%s1007_s1 + $0x18] sm:$0xff] (!%p235_p3)  ;;  %v329_v12 = vlaneseq (!%p235_p3) }
   0x7   : > { %238 = sbr.rel (%p235_p3) target bundleno = 557 (0x22d), region = 40  ;;  %850 = vset.pattern.permute.xlu0 (!%p235_p3), %v881_v1  ;;  %846 = vset.pattern.permute.xlu1 (!%p235_p3), %v882_v2  ;;  %v306_v6 = vld [vmem:[%s1007_s1 + $0x10] sm:$0xff] (!%p235_p3)  ;;  %v884_v7 = vmov (!%p235_p3), 0   ;;  %v505_v8 = vld [vmem:[%s1008_s2] sm:$0xff] (!%p235_p3)  ;;  %v508_v9 = vld [vmem:[%s1008_s2 + $0x18] sm:$0xff] (!%p235_p3)  ;;  %p273_p4 = scmp.lt.s32.totalorder (!%p235_p3), %s871_s21, 1 }
   0x8   : > { %456 = vperm.xlu0 (!%p235_p3), %850, %v304_v0   ;;  %356 = vperm.xlu1 (!%p235_p3), %846, %v304_v0   ;;  %v506_v10 = vld [vmem:[%s1008_s2 + $0x8] sm:$0xff] (!%p235_p3)  ;;  %v507_v11 = vld [vmem:[%s1008_s2 + $0x10] sm:$0xff] (!%p235_p3)  ;;  %v330_v13 = vshrl.u32 (!%p235_p3), %v329_v12, 7  ;;  %vm886_vm0 = vmmov (!%p235_p3), 0   ;;  %vm672_vm1 = vcmask (!%p235_p3), 7168   ;;  %vm598_vm2 = vcmask (!%p235_p3), 261120  }
   0xa   : > { %v373_v16 = vsub.s32 (!%p235_p3), 1, %v330_v13  ;;  %v377_v17 = vsub.s32 (!%p235_p3), 5, %v330_v13  ;;  %v331_v18 = vsub.s32 (!%p235_p3), 0, %v330_v13  ;;  %v335_v19 = vsub.s32 (!%p235_p3), 4, %v330_v13 }
   0xb   : > { %v423_v23 = vsub.s32 (!%p235_p3), 2, %v330_v13  ;;  %v427_v24 = vsub.s32 (!%p235_p3), 6, %v330_v13  ;;  %v473_v29 = vsub.s32 (!%p235_p3), 3, %v330_v13  ;;  %v477_v30 = vsub.s32 (!%p235_p3), 7, %v330_v13 }
   0xc   : > { %851 = vset.pattern.permute.xlu0 (!%p235_p3), %v883_v4  ;;  %360 = vperm.xlu1 (!%p235_p3), %846, %v305_v3  }
   0xd   : > { %406 = vperm.xlu0 (!%p235_p3), %851, %v304_v0  }
   0xe   : > { %s1018_s21 = smov (!%p273_p4, %s871_s21), 1 }
   0xf   : > { %s791_s17 = sshll.u32 %s1018_s21, 3  ;;  %s792_s25 = sshll.u32 %s1018_s21, 5 }
  0x10   : > { %847 = vset.pattern.permute.xlu1 %v883_v4  ;;  %s280_s20 = scalar_lea.vmem %s1006_s0, %s791_s17  ;;  %s290_s28 = scalar_lea.vmem %s1012_s6, %s792_s25 }
  0x11   : > { %418 = vperm.xlu0 %851, %v307_v5   ;;  %410 = vperm.xlu1 %847, %v305_v3   ;;  %v303_v20 = vld [vmem:[%s280_s20] sm:$0xff]  ;;  %s285_s11 = scalar_lea.vmem %s1011_s5, %s791_s17 }
  0x12   : > { %v374_v25 = vrot.slane %v303_v20, %v373_v16  ;;  %v378_v26 = vrot.slane %v303_v20, %v377_v17  ;;  %v332_v27 = vrot.slane %v303_v20, %v331_v18  ;;  %v336_v28 = vrot.slane %v303_v20, %v335_v19 }
  0x13   : > { %v424_v33 = vrot.slane %v303_v20, %v423_v23  ;;  %v428_v34 = vrot.slane %v303_v20, %v427_v24  ;;  %v474_v39 = vrot.slane %v303_v20, %v473_v29  ;;  %v478_v40 = vrot.slane %v303_v20, %v477_v30 }
  0x14   : > { %v384_v35 = vrot.slane %v374_v25, %v373_v16  ;;  %v388_v36 = vrot.slane %v378_v26, %v373_v16  ;;  %v342_v37 = vrot.slane %v332_v27, %v331_v18  ;;  %v346_v38 = vrot.slane %v336_v28, %v331_v18 }
  0x15   : > { %854 = vset.pattern.permute.xlu0 %v884_v7  ;;  %848 = vset.pattern.permute.xlu1 %v884_v7  ;;  %v434_v41 = vrot.slane %v424_v33, %v423_v23  ;;  %v438_v42 = vrot.slane %v428_v34, %v423_v23  ;;  %v484_v49 = vrot.slane %v474_v39, %v473_v29 }
  0x16   : > { %310 = vperm.xlu0 %854, %v304_v0   ;;  %320 = vperm.xlu1 %848, %v306_v6   ;;  %v488_v50 = vrot.slane %v478_v40, %v473_v29 }
  0x1a   : > { %315 = vperm.xlu0 %854, %v305_v3   ;;  %849 = vset.pattern.permute.xlu1 %v882_v2 }
  0x1b   : > { %364 = vperm.xlu1 %849, %v306_v6  }
  0x1e   : > { %325 = vperm.xlu0 %854, %v307_v5  }
  0x1f   : > { %368 = vperm.xlu1 %849, %v307_v5  }
  0x22   : > { %511 = vperm.xlu0 %854, %v505_v8  }
  0x23   : > { %852 = vset.pattern.permute.xlu1 %v881_v1 }
  0x24   : > { %460 = vperm.xlu1 %852, %v305_v3  }
  0x26   : > { %526 = vperm.xlu0 %854, %v508_v9  }
  0x28   : > { %853 = vset.pattern.permute.xlu1 %v883_v4 }
  0x29   : > { %414 = vperm.xlu1 %853, %v306_v6  }
  0x2d   : > { %855 = vset.pattern.permute.xlu1 %v881_v1 }
  0x2e   : > { %464 = vperm.xlu1 %855, %v306_v6  }
  0x32   : > { %468 = vperm.xlu1 %855, %v307_v5  }
  0x36   : > { %856 = vset.pattern.permute.xlu1 %v884_v7 }
  0x37   : > { %516 = vperm.xlu1 %856, %v506_v10  }
  0x3b   : > { %521 = vperm.xlu1 %856, %v507_v11  }
  0x87   : > { %v357_v14 = vpop.permute.xlu1 %356  ;;  %v457_v15 = vpop.permute.xlu0 %456 }
  0x88   : > { %v389_v45 = vmul.f32 %v384_v35, %v357_v14  ;;  %v390_v46 = vmul.f32 %v388_v36, %v357_v14  ;;  %v489_v57 = vmul.f32 %v484_v49, %v457_v15  ;;  %v490_v58 = vmul.f32 %v488_v50, %v457_v15 }
  0x8b   : > { %v361_v21 = vpop.permute.xlu1 %360 }
  0x8c   : > { %v407_v22 = vpop.permute.xlu0 %406  ;;  %v391_v15 = vmul.f32 %v384_v35, %v361_v21  ;;  %v392_v16 = vmul.f32 %v388_v36, %v361_v21 }
  0x8d   : > { %v439_v51 = vmul.f32 %v434_v41, %v407_v22  ;;  %v440_v52 = vmul.f32 %v438_v42, %v407_v22 }
  0x90   : > { %v411_v31 = vpop.permute.xlu1 %410  ;;  %v419_v32 = vpop.permute.xlu0 %418 }
  0x91   : > { %v445_v18 = vmul.f32 %v434_v41, %v419_v32  ;;  %v446_v19 = vmul.f32 %v438_v42, %v419_v32  ;;  %v441_v25 = vmul.f32 %v434_v41, %v411_v31  ;;  %v442_v26 = vmul.f32 %v438_v42, %v411_v31 }
  0x95   : > { %v311_v43 = vpop.permute.xlu0 %310  ;;  %v321_v44 = vpop.permute.xlu1 %320 }
  0x96   : > { %v347_v47 = vmul.f32 %v342_v37, %v311_v43  ;;  %v348_v48 = vmul.f32 %v346_v38, %v311_v43  ;;  %v351_v29 = vmul.f32 %v342_v37, %v321_v44  ;;  %v352_v30 = vmul.f32 %v346_v38, %v321_v44 }
  0x98   : > { %v397_v53 = vadd.f32 %v389_v45, %v347_v47  ;;  %v398_v54 = vadd.f32 %v390_v46, %v348_v48 }
  0x99   : > { %v316_v55 = vpop.permute.xlu0 %315 }
  0x9a   : > { %v365_v56 = vpop.permute.xlu1 %364  ;;  %v447_v59 = vadd.f32 %v439_v51, %v397_v53  ;;  %v448_v60 = vadd.f32 %v440_v52, %v398_v54  ;;  %v349_v13 = vmul.f32 %v342_v37, %v316_v55  ;;  %v350_v14 = vmul.f32 %v346_v38, %v316_v55 }
  0x9b   : > { %v393_v27 = vmul.f32 %v384_v35, %v365_v56  ;;  %v394_v28 = vmul.f32 %v388_v36, %v365_v56 }
  0x9c   : > { %v497_v63 = vadd.f32 %v489_v57, %v447_v59  ;;  %v498_v0 = vadd.f32 %v490_v58, %v448_v60  ;;  %v399_v23 = vadd.f32 %v391_v15, %v349_v13  ;;  %v400_v24 = vadd.f32 %v392_v16, %v350_v14 }
  0x9d   : > { %v326_v61 = vpop.permute.xlu0 %325  ;;  %v401_v51 = vadd.f32 %v393_v27, %v351_v29  ;;  %v402_v52 = vadd.f32 %v394_v28, %v352_v30 }
  0x9e   : > { %v369_v62 = vpop.permute.xlu1 %368  ;;  %v353_v9 = vmul.f32 %v342_v37, %v326_v61  ;;  %v354_v10 = vmul.f32 %v346_v38, %v326_v61  ;;  %v449_v32 = vadd.f32 %v441_v25, %v399_v23  ;;  %v450_v48 = vadd.f32 %v442_v26, %v400_v24 }
  0x9f   : > { %v395_v11 = vmul.f32 %v384_v35, %v369_v62  ;;  %v396_v12 = vmul.f32 %v388_v36, %v369_v62 }
  0xa1   : > { %v512_v1 = vpop.permute.xlu0 %511  ;;  %v403_v20 = vadd.f32 %v395_v11, %v353_v9  ;;  %v404_v22 = vadd.f32 %v396_v12, %v354_v10 }
  0xa2   : > { %v529_v2 = vadd.f32 %v512_v1, %v497_v63  ;;  %v530_v3 = vadd.f32 %v512_v1, %v498_v0 }
  0xa3   : > { %v461_v4 = vpop.permute.xlu1 %460  ;;  %v453_v40 = vadd.f32 %v445_v18, %v403_v20  ;;  %v454_v43 = vadd.f32 %v446_v19, %v404_v22  ;;  %v596_v19 = vld [vmem:[%s1009_s3] sm:$0xff] }
  0xa4   : > { %v537_v5 = vmax.f32 %v529_v2, 0.0  ;;  %v538_v6 = vmax.f32 %v530_v3, 0.0  ;;  %v491_v33 = vmul.f32 %v484_v49, %v461_v4  ;;  %v492_v34 = vmul.f32 %v488_v50, %v461_v4  ;;  %v597_v20 = vld [vmem:[%s1010_s4] sm:$0xff] }
  0xa5   : > { %v527_v31 = vpop.permute.xlu0 %526 }
  0xa6   : > { %v580_v7 = vadd.f32 %v538_v6, %v537_v5  ;;  %v499_v37 = vadd.f32 %v491_v33, %v449_v32  ;;  %v500_v38 = vadd.f32 %v492_v34, %v450_v48 }
  0xa8   : > { %v415_v8 = vpop.permute.xlu1 %414  ;;  %581 = vadd.xlane.f32.xlu1 %v580_v7  ;;  %v885_v7 = vmov 0.0|0.0  }
  0xa9   : > { %v443_v46 = vmul.f32 %v434_v41, %v415_v8  ;;  %v444_v47 = vmul.f32 %v438_v42, %v415_v8  ;;  %809 = vmatprep.subr.bf16.mxu0 %v885_v7  ;;  %v887_v8 = vmov 0.0  }
  0xaa   : > { %806 = vmatprep.mubr.msk.f32.mxu0 %vm886_vm0, %v887_v8 }
  0xab   : > { %v451_v57 = vadd.f32 %v443_v46, %v401_v51  ;;  %v452_v58 = vadd.f32 %v444_v47, %v402_v52 }
  0xad   : > { %v465_v17 = vpop.permute.xlu1 %464 }
  0xae   : > { %v493_v35 = vmul.f32 %v484_v49, %v465_v17  ;;  %v494_v36 = vmul.f32 %v488_v50, %v465_v17 }
  0xb0   : > { %v501_v63 = vadd.f32 %v493_v35, %v451_v57  ;;  %v502_v0 = vadd.f32 %v494_v36, %v452_v58 }
  0xb1   : > { %v469_v39 = vpop.permute.xlu1 %468 }
  0xb2   : > { %v495_v45 = vmul.f32 %v484_v49, %v469_v39  ;;  %v496_v21 = vmul.f32 %v488_v50, %v469_v39 }
  0xb4   : > { %v503_v53 = vadd.f32 %v495_v45, %v453_v40  ;;  %v504_v54 = vadd.f32 %v496_v21, %v454_v43 }
  0xb6   : > { %v517_v44 = vpop.permute.xlu1 %516  ;;  %v535_v55 = vadd.f32 %v527_v31, %v503_v53  ;;  %v536_v56 = vadd.f32 %v527_v31, %v504_v54 }
  0xb7   : > { %v531_v59 = vadd.f32 %v517_v44, %v499_v37  ;;  %v532_v60 = vadd.f32 %v517_v44, %v500_v38 }
  0xb8   : > { %v543_v41 = vmax.f32 %v535_v55, 0.0  ;;  %v544_v42 = vmax.f32 %v536_v56, 0.0 }
  0xb9   : > { %v539_v61 = vmax.f32 %v531_v59, 0.0  ;;  %v540_v62 = vmax.f32 %v532_v60, 0.0 }
  0xba   : > { %v522_v1 = vpop.permute.xlu1 %521  ;;  %v589_v2 = vadd.f32 %v544_v42, %v543_v41 }
  0xbb   : > { %v533_v49 = vadd.f32 %v522_v1, %v501_v63  ;;  %v534_v50 = vadd.f32 %v522_v1, %v502_v0  ;;  %v583_v3 = vadd.f32 %v540_v62, %v539_v61 }
  0xbc   : > { %590 = vadd.xlane.f32.xlu1 %v589_v2 }
  0xbd   : > { %v541_v4 = vmax.f32 %v533_v49, 0.0  ;;  %v542_v5 = vmax.f32 %v534_v50, 0.0  ;;  %584 = vadd.xlane.f32.xlu0 %v583_v3 }
  0xbf   : > { %v586_v6 = vadd.f32 %v542_v5, %v541_v4 }
  0xc1   : > { %587 = vadd.xlane.f32.xlu0 %v586_v6 }
 0x135   : > { %v582_v9 = vpop.xlane.xlu1 %581 }
 0x136   : > { %v592_v10 = vmul.f32 0.00390625, %v582_v9 }
 0x138   : > { %673 = vst.msk [vmem:[%s290_s28] sm:$0xff] %vm672_vm1, %v592_v10 }
 0x149   : > { %v591_v11 = vpop.xlane.xlu1 %590 }
 0x14a   : > { %v595_v12 = vmul.f32 0.00390625, %v591_v11  ;;  %v585_v13 = vpop.xlane.xlu0 %584 }
 0x14b   : > { %v593_v14 = vmul.f32 0.00390625, %v585_v13 }
 0x14c   : > { %676 = vst.msk [vmem:[%s290_s28 + $0x18] sm:$0xff] %vm672_vm1, %v595_v12 }
 0x14d   : > { %674 = vst.msk [vmem:[%s290_s28 + $0x8] sm:$0xff] %vm672_vm1, %v593_v14  ;;  %v810_v15 = vpack.c.bf16 %v593_v14, %v592_v10 }
 0x14e   : > { %v588_v16 = vpop.xlane.xlu0 %587 }
 0x14f   : > { %v594_v17 = vmul.f32 0.00390625, %v588_v16  ;;  %811 = vmatpush3.bf16.msra.mxu0 %v810_v15 }
 0x150   : > { %812 = vmatprep.subr.bf16.mxu0 %v885_v7 }
 0x151   : > { %v813_v18 = vpack.c.bf16 %v595_v12, %v594_v17  ;;  %675 = vst.msk [vmem:[%s290_s28 + $0x10] sm:$0xff] %vm672_vm1, %v594_v17 }
 0x153   : > { %814 = vmatpush3.bf16.msra.mxu0 %v813_v18 }
 0x156   : > { %807 = vmatmul.mubr.msk.f32.vlgmr.msra.gmra.mrb[0].mxu0 %vm598_vm2, %v596_v19 }
 0x229   : > { %v668_v22 = vpop.f32.mrb[0].mxu0 }
 0x22a   : > { %v669_v23 = vadd.f32 %v668_v22, %v597_v20  ;;  %v808_v24 = vpop.f32.mrb[1].mxu0 }
 0x22c   : > { %677 = vst.msk [vmem:[%s285_s11] sm:$0xff] %vm672_vm1, %v669_v23 }
 0x22d PF: > { %s17_s23 = sadd.s32 1, %s879_s23   ;;  %s1013_s21 = smov %s875_s22 }
 0x22e   : > { %p14_p5 = scmp.ge.s32.totalorder %s17_s23, 4   ;;  %s1014_s22 = smov %s1016_s24 }
 0x230   :  { %16 = sbr.rel (!%p14_p5) target bundleno = 2 (0x2), region = 90 }

</bundles_post_ra>
